<compile_context>
chip_gen: v7x
topology: tpu7x:2x2x1
jax: 0.10.0
libtpu: 0.0.40
codegen_flags: <defaults>
</compile_context>

<pallas_src>
import jax
import jax.numpy as jnp
from jax.experimental import pallas as pl
from jax.experimental.pallas import tpu as pltpu

H1, H2, OUT = 500, 300, 2          # real layer widths (from the PyTorch module)
H1P, H2P, OUTP = 512, 384, 128     # MXU/lane-aligned padded widths


def _round_up(n, m):
    return ((n + m - 1) // m) * m


def _cdiv(a, b):
    return -(-a // b)


def mlp_kernel(x_ref, w1_ref, b1_ref, w2_ref, b2_ref, w3_ref, b3_ref, o_ref):
    # In-kernel cast of the activations (rides the VPU under the MXU).
    x = x_ref[...].astype(jnp.bfloat16)
    # fc1 + ReLU   (bf16 operands, f32 accumulate, bias/ReLU in f32)
    h1 = jnp.dot(x, w1_ref[...], preferred_element_type=jnp.float32)
    h1 = jnp.maximum(h1 + b1_ref[...], 0.0).astype(jnp.bfloat16)
    # fc2 + ReLU
    h2 = jnp.dot(h1, w2_ref[...], preferred_element_type=jnp.float32)
    h2 = jnp.maximum(h2 + b2_ref[...], 0.0).astype(jnp.bfloat16)
    # fc3 (no activation) -- keep only the 2 real logit columns for writeback.
    h3 = jnp.dot(h2, w3_ref[...], preferred_element_type=jnp.float32)
    o_ref[...] = (h3[:, :OUT] + b3_ref[...]).astype(o_ref.dtype)


def prepare_params(w1, b1, w2, b2, w3, b3):
    """One-time (per model) padding + bf16 cast of the weights.

    w*: [in, out] (transposed vs. PyTorch nn.Linear.weight), b*: [out].
    Zero padding keeps padded hidden columns exactly 0 through Linear+ReLU.
    """
    F = w1.shape[0]
    w1p = jnp.zeros((F, H1P), jnp.bfloat16).at[:, :H1].set(w1.astype(jnp.bfloat16))
    b1p = jnp.zeros((1, H1P), jnp.float32).at[0, :H1].set(b1.astype(jnp.float32))
    w2p = jnp.zeros((H1P, H2P), jnp.bfloat16).at[:H1, :H2].set(w2.astype(jnp.bfloat16))
    b2p = jnp.zeros((1, H2P), jnp.float32).at[0, :H2].set(b2.astype(jnp.float32))
    w3p = jnp.zeros((H2P, OUTP), jnp.bfloat16).at[:H2, :OUT].set(w3.astype(jnp.bfloat16))
    b3p = b3.astype(jnp.float32).reshape(1, OUT)   # real width: output is (B, 2)
    return (w1p, b1p, w2p, b2p, w3p, b3p)


@jax.jit
def net_forward(x, params):
    """Pallas forward pass equivalent to Net.forward.

    x: [B, n_feature] float32 (or bf16)
    params: output of prepare_params
    returns: [B, 2] float32 logits
    """
    w1p, b1p, w2p, b2p, w3p, b3p = params
    B, F = x.shape

    # Batch tiling: tile must be a multiple of 8 (sublane). Weights stay
    # VMEM-resident across the whole grid (constant block index). Big tiles
    # amortize per-step overhead; for large B keep >= 2 grid steps so v7x's
    # two TensorCores both get work under dimension_semantics=("parallel",).
    CAP = 2048
    TILE_B = min(CAP, _round_up(B, 8))
    if B >= 512 and _cdiv(B, TILE_B) < 2:
        TILE_B = _round_up(_cdiv(B, 2), 8)
    grid_b = _cdiv(B, TILE_B)

    flops = 2 * grid_b * TILE_B * (F * H1P + H1P * H2P + H2P * OUTP)
    bytes_accessed = (
        x.size * x.dtype.itemsize
        + (w1p.size + w2p.size + w3p.size) * 2
        + (b1p.size + b2p.size + b3p.size) * 4
        + B * OUT * 4
    )

    out = pl.pallas_call(
        mlp_kernel,
        out_shape=jax.ShapeDtypeStruct((B, OUT), jnp.float32),
        grid_spec=pl.GridSpec(
            grid=(grid_b,),
            in_specs=[
                pl.BlockSpec((TILE_B, F), lambda i: (i, 0)),   # x tile per step
                pl.BlockSpec((F, H1P), lambda i: (0, 0)),      # weights resident
                pl.BlockSpec((1, H1P), lambda i: (0, 0)),
                pl.BlockSpec((H1P, H2P), lambda i: (0, 0)),
                pl.BlockSpec((1, H2P), lambda i: (0, 0)),
                pl.BlockSpec((H2P, OUTP), lambda i: (0, 0)),
                pl.BlockSpec((1, OUT), lambda i: (0, 0)),
            ],
            out_specs=pl.BlockSpec((TILE_B, OUT), lambda i: (i, 0)),
        ),
        compiler_params=pltpu.CompilerParams(
            dimension_semantics=("parallel",),      # shards batch across v7x's 2 TCs
            vmem_limit_bytes=32 * 1024 * 1024,      # covers 2048-row tile on v5e too
        ),
        cost_estimate=pl.CostEstimate(
            flops=int(flops), transcendentals=0, bytes_accessed=int(bytes_accessed)
        ),
    )(x, w1p, b1p, w2p, b2p, w3p, b3p)

    return out


def init_params(key, n_feature):
    """Deterministic PyTorch-style init: U(-1/sqrt(fan_in), 1/sqrt(fan_in))."""
    dims = [(n_feature, H1), (H1, H2), (H2, OUT)]
    params = []
    for (fan_in, fan_out) in dims:
        key, kw, kb = jax.random.split(key, 3)
        bound = 1.0 / jnp.sqrt(jnp.float32(fan_in))
        w = jax.random.uniform(kw, (fan_in, fan_out), jnp.float32, -bound, bound)
        b = jax.random.uniform(kb, (fan_out,), jnp.float32, -bound, bound)
        params += [w, b]
    return params


def _reference(x, w1, b1, w2, b2, w3, b3):
    """Pure-JAX reference with the same bf16-weight / f32-accumulate semantics."""
    xb = x.astype(jnp.bfloat16)
    h = jnp.dot(xb, w1.astype(jnp.bfloat16), preferred_element_type=jnp.float32)
    h = jnp.maximum(h + b1, 0.0).astype(jnp.bfloat16)
    h = jnp.dot(h, w2.astype(jnp.bfloat16), preferred_element_type=jnp.float32)
    h = jnp.maximum(h + b2, 0.0).astype(jnp.bfloat16)
    h = jnp.dot(h, w3.astype(jnp.bfloat16), preferred_element_type=jnp.float32)
    return h + b3


if __name__ == "__main__":
    # TODO(synk): eval_layer_output/get_grad bookkeeping lists are training/debug
    # state on the PyTorch module, not part of forward; not translated.
    key = jax.random.PRNGKey(0)
    n_feature = 32   # "adult" tabular features (small synthetic size)

    kx, kp = jax.random.split(key, 2)
    w1, b1, w2, b2, w3, b3 = init_params(kp, n_feature)
    params = prepare_params(w1, b1, w2, b2, w3, b3)

    # B=8   : single exact tile, grid=(1,)
    # B=260 : single partial tile (TILE_B=264 > B), masked writeback, no padding
    # B=600 : two grid steps (TILE_B=304), partial trailing block, megacore path
    for batch, kb in zip((8, 260, 600), jax.random.split(kx, 3)):
        x = jax.random.normal(kb, (batch, n_feature), jnp.float32)
        out = jax.block_until_ready(net_forward(x, params))
        ref = _reference(x, w1, b1, w2, b2, w3, b3)
        assert out.shape == (batch, OUT), out.shape
        assert jnp.allclose(out, ref, atol=2e-3, rtol=2e-3), (
            f"mismatch vs reference (batch={batch})")

    print("KERNEL_OK")
</pallas_src>

<mosaic_0001>
module attributes {stable_mosaic.version = 11 : i64} {
  func.func @mlp_kernel(%arg0: i32, %arg1: memref<8x32xf32, #tpu.memory_space<vmem>>, %arg2: memref<32x512xbf16, #tpu.memory_space<vmem>>, %arg3: memref<1x512xf32, #tpu.memory_space<vmem>>, %arg4: memref<512x384xbf16, #tpu.memory_space<vmem>>, %arg5: memref<1x384xf32, #tpu.memory_space<vmem>>, %arg6: memref<384x128xbf16, #tpu.memory_space<vmem>>, %arg7: memref<1x2xf32, #tpu.memory_space<vmem>>, %arg8: memref<8x2xf32, #tpu.memory_space<vmem>>) attributes {dimension_semantics = [#tpu.dimension_semantics<parallel>], iteration_bounds = array<i64: 1>, scalar_prefetch = 0 : i64, scratch_operands = 0 : i64, tpu.core_type = #tpu.core_type<tc>, window_params = [{transform_indices = @transform_0, window_bounds = array<i64: 8, 32>}, {pipeline_mode = #tpu.pipeline_mode<synchronous>, transform_indices = @transform_1, window_bounds = array<i64: 32, 512>}, {pipeline_mode = #tpu.pipeline_mode<synchronous>, transform_indices = @transform_2, window_bounds = array<i64: 1, 512>}, {pipeline_mode = #tpu.pipeline_mode<synchronous>, transform_indices = @transform_3, window_bounds = array<i64: 512, 384>}, {pipeline_mode = #tpu.pipeline_mode<synchronous>, transform_indices = @transform_4, window_bounds = array<i64: 1, 384>}, {pipeline_mode = #tpu.pipeline_mode<synchronous>, transform_indices = @transform_5, window_bounds = array<i64: 384, 128>}, {pipeline_mode = #tpu.pipeline_mode<synchronous>, transform_indices = @transform_6, window_bounds = array<i64: 1, 2>}, {transform_indices = @transform_7, window_bounds = array<i64: 8, 2>}]} {
    %c0 = arith.constant 0 : index
    %c0_0 = arith.constant 0 : index
    %0 = vector.load %arg1[%c0, %c0_0] : memref<8x32xf32, #tpu.memory_space<vmem>>, vector<8x32xf32>
    %1 = arith.truncf %0 : vector<8x32xf32> to vector<8x32xbf16>
    %c0_1 = arith.constant 0 : index
    %c0_2 = arith.constant 0 : index
    %2 = vector.load %arg2[%c0_1, %c0_2] : memref<32x512xbf16, #tpu.memory_space<vmem>>, vector<32x512xbf16>
    %cst = arith.constant dense<0.000000e+00> : vector<8x512xf32>
    %3 = tpu.matmul %1, %2, %cst {dimension_numbers = #tpu.dot_dimension_numbers<[1], [0], [0], [1], [0, 0, 1, 1], [], []>} : vector<8x32xbf16>, vector<32x512xbf16>, vector<8x512xf32> -> vector<8x512xf32>
    %c0_3 = arith.constant 0 : index
    %c0_4 = arith.constant 0 : index
    %4 = vector.load %arg3[%c0_3, %c0_4] : memref<1x512xf32, #tpu.memory_space<vmem>>, vector<1x512xf32>
    %5 = vector.broadcast %4 : vector<1x512xf32> to vector<8x512xf32>
    %6 = arith.addf %3, %5 : vector<8x512xf32>
    %cst_5 = arith.constant 0.000000e+00 : f32
    %7 = vector.broadcast %cst_5 : f32 to vector<8x512xf32>
    %8 = arith.maximumf %6, %7 : vector<8x512xf32>
    %9 = arith.truncf %8 : vector<8x512xf32> to vector<8x512xbf16>
    %c0_6 = arith.constant 0 : index
    %c0_7 = arith.constant 0 : index
    %10 = vector.load %arg4[%c0_6, %c0_7] : memref<512x384xbf16, #tpu.memory_space<vmem>>, vector<512x384xbf16>
    %cst_8 = arith.constant dense<0.000000e+00> : vector<8x384xf32>
    %11 = tpu.matmul %9, %10, %cst_8 {dimension_numbers = #tpu.dot_dimension_numbers<[1], [0], [0], [1], [0, 0, 1, 1], [], []>} : vector<8x512xbf16>, vector<512x384xbf16>, vector<8x384xf32> -> vector<8x384xf32>
    %c0_9 = arith.constant 0 : index
    %c0_10 = arith.constant 0 : index
    %12 = vector.load %arg5[%c0_9, %c0_10] : memref<1x384xf32, #tpu.memory_space<vmem>>, vector<1x384xf32>
    %13 = vector.broadcast %12 : vector<1x384xf32> to vector<8x384xf32>
    %14 = arith.addf %11, %13 : vector<8x384xf32>
    %cst_11 = arith.constant 0.000000e+00 : f32
    %15 = vector.broadcast %cst_11 : f32 to vector<8x384xf32>
    %16 = arith.maximumf %14, %15 : vector<8x384xf32>
    %17 = arith.truncf %16 : vector<8x384xf32> to vector<8x384xbf16>
    %c0_12 = arith.constant 0 : index
    %c0_13 = arith.constant 0 : index
    %18 = vector.load %arg6[%c0_12, %c0_13] : memref<384x128xbf16, #tpu.memory_space<vmem>>, vector<384x128xbf16>
    %cst_14 = arith.constant dense<0.000000e+00> : vector<8x128xf32>
    %19 = tpu.matmul %17, %18, %cst_14 {dimension_numbers = #tpu.dot_dimension_numbers<[1], [0], [0], [1], [0, 0, 1, 1], [], []>} : vector<8x384xbf16>, vector<384x128xbf16>, vector<8x128xf32> -> vector<8x128xf32>
    %20 = vector.extract_strided_slice %19 {offsets = [0, 0], sizes = [8, 2], strides = [1, 1]} : vector<8x128xf32> to vector<8x2xf32>
    %c0_15 = arith.constant 0 : index
    %c0_16 = arith.constant 0 : index
    %21 = vector.load %arg7[%c0_15, %c0_16] : memref<1x2xf32, #tpu.memory_space<vmem>>, vector<1x2xf32>
    %22 = vector.broadcast %21 : vector<1x2xf32> to vector<8x2xf32>
    %23 = arith.addf %20, %22 : vector<8x2xf32>
    %c0_17 = arith.constant 0 : index
    %c0_18 = arith.constant 0 : index
    %24 = vector.load %arg8[%c0_17, %c0_18] : memref<8x2xf32, #tpu.memory_space<vmem>>, vector<8x2xf32>
    tpu.vector_store %arg8[%c0_17, %c0_18], %23 {strides = array<i32>} : memref<8x2xf32, #tpu.memory_space<vmem>>, vector<8x2xf32>,
    return
  }
  func.func @transform_0(%arg0: i32) -> (i32, i32) {
    %c0_i32 = arith.constant 0 : i32
    %c0_i32_0 = arith.constant 0 : i32
    return %arg0, %c0_i32 : i32, i32
  }
  func.func @transform_1(%arg0: i32) -> (i32, i32) {
    %c0_i32 = arith.constant 0 : i32
    %c0_i32_0 = arith.constant 0 : i32
    %c0_i32_1 = arith.constant 0 : i32
    return %c0_i32, %c0_i32_0 : i32, i32
  }
  func.func @transform_2(%arg0: i32) -> (i32, i32) {
    %c0_i32 = arith.constant 0 : i32
    %c0_i32_0 = arith.constant 0 : i32
    %c0_i32_1 = arith.constant 0 : i32
    return %c0_i32, %c0_i32_0 : i32, i32
  }
  func.func @transform_3(%arg0: i32) -> (i32, i32) {
    %c0_i32 = arith.constant 0 : i32
    %c0_i32_0 = arith.constant 0 : i32
    %c0_i32_1 = arith.constant 0 : i32
    return %c0_i32, %c0_i32_0 : i32, i32
  }
  func.func @transform_4(%arg0: i32) -> (i32, i32) {
    %c0_i32 = arith.constant 0 : i32
    %c0_i32_0 = arith.constant 0 : i32
    %c0_i32_1 = arith.constant 0 : i32
    return %c0_i32, %c0_i32_0 : i32, i32
  }
  func.func @transform_5(%arg0: i32) -> (i32, i32) {
    %c0_i32 = arith.constant 0 : i32
    %c0_i32_0 = arith.constant 0 : i32
    %c0_i32_1 = arith.constant 0 : i32
    return %c0_i32, %c0_i32_0 : i32, i32
  }
  func.func @transform_6(%arg0: i32) -> (i32, i32) {
    %c0_i32 = arith.constant 0 : i32
    %c0_i32_0 = arith.constant 0 : i32
    %c0_i32_1 = arith.constant 0 : i32
    return %c0_i32, %c0_i32_0 : i32, i32
  }
  func.func @transform_7(%arg0: i32) -> (i32, i32) {
    %c0_i32 = arith.constant 0 : i32
    %c0_i32_0 = arith.constant 0 : i32
    return %arg0, %c0_i32 : i32, i32
  }
}

</mosaic_0001>

<bundles_post_ra>
// kernel: net_forward.1
= control target key start
LH: loop header
LB: loop body
LE: loop exit
PB: predicated region body
PF: predicated region fallthrough
CT: control target
= control target key end

     0   :  { %12 = vsyncpa [#allocation3], 0  ;;  %s2000_s0 = inlined_call_operand.hbm [shape: f32[8,32], index: 0, kind: input, shape index: {}]   ;;  %s2001_s1 = inlined_call_operand.hbm [shape: bf16[32,512], index: 1, kind: input, shape index: {}]   ;;  %s2002_s2 = inlined_call_operand.vmem [shape: f32[1,512], index: 2, kind: input, shape index: {}]   ;;  %s2003_s3 = inlined_call_operand.hbm [shape: bf16[512,384], index: 3, kind: input, shape index: {}]   ;;  %s2004_s4 = inlined_call_operand.vmem [shape: f32[1,384], index: 4, kind: input, shape index: {}]   ;;  %s2005_s5 = inlined_call_operand.hbm [shape: bf16[384,128], index: 5, kind: input, shape index: {}]   ;;  %s2006_s6 = inlined_call_operand.vmem [shape: f32[1,2], index: 6, kind: input, shape index: {}]   ;;  %s2007_s7 = inlined_call_operand.vmem [shape: f32[8,2], index: 7, kind: output, shape index: {}]  }
   0x1   :  { %13 = vsyncpa [#allocation5], 0 }
   0x2   :  { %14 = vsyncpa [#allocation8], 0  ;;  %s1863_s24 = smov [#allocation4]   ;;  %s1769_s28 = scalar_lea.hbm %s2001_s1, 1024 }
   0x3   :  { %s30_s25 = sshll.u32 %s1863_s24, 4  ;;  %p1770_p0 = scmp.ne.s32.totalorder %s2001_s1, %s1769_s28  ;;  %s31_s25 = int_to_ptr.vmem [resolvable:$true] %s30_s25 }
   0x4   :  { %p1773_p1 = scmp.lt.u32.totalorder %s1769_s28, %s2001_s1 }
   0x6   :  { %p1775_p2 = pnand %p1773_p1, %p1770_p0 }
   0x8   :  { %1778 = shalt.err (!%p1775_p2)
}
   0x9   :  { %s1779_s10 = scalar_lea.vmem %s31_s25, 1024  ;;  %p1784_p4 = scmp.lt.s32.totalorder %s31_s25, %s31_s25 }
   0xa   :  { %p1780_p3 = scmp.ne.s32.totalorder %s31_s25, %s1779_s10  ;;  %p1785_p5 = scmp.lt.s32.totalorder %s1779_s10, %s1779_s10 }
   0xc   :  { %p1786_p6 = por %p1785_p5, %p1784_p4 }
   0xe   :  { %p1787_p7 = pnand %p1786_p6, %p1780_p3 }
  0x10   :  { %1790 = shalt.err (!%p1787_p7)
}
  0x11   :  { %s1864_s11 = smov 256   ;;  %s1865_s12 = smov 16  }
  0x12   :  { %36 = dma.hbm_to_vmem [thread:$0]  %s2001_s1, 1024, %s31_s25, [#allocation5], %s1864_s11, %s1864_s11, %s1865_s12  }
  0x13   :  { %s1866_s15 = smov [#allocation2]   ;;  %s1867_s17 = smov [#allocation6]  }
  0x14   :  { %s21_s16 = sshll.u32 %s1866_s15, 4  ;;  %s44_s18 = sshll.u32 %s1867_s17, 4  ;;  %s22_s16 = int_to_ptr.vmem [resolvable:$true] %s21_s16  ;;  %s45_s18 = int_to_ptr.vmem [resolvable:$true] %s44_s18 }
  0x15   :  { %s1791_s21 = scalar_lea.hbm %s2000_s0, 128 }
  0x16   :  { %p1792_p8 = scmp.ne.s32.totalorder %s2000_s0, %s1791_s21  ;;  %p1795_p9 = scmp.lt.u32.totalorder %s1791_s21, %s2000_s0 }
  0x18   :  { %p1797_p10 = pnand %p1795_p9, %p1792_p8 }
  0x1a   :  { %1800 = shalt.err (!%p1797_p10)
}
  0x1b   :  { %s1801_s1 = scalar_lea.vmem %s22_s16, 128  ;;  %p1806_p12 = scmp.lt.s32.totalorder %s22_s16, %s22_s16 }
  0x1c   :  { %p1802_p11 = scmp.ne.s32.totalorder %s22_s16, %s1801_s1  ;;  %p1807_p13 = scmp.lt.s32.totalorder %s1801_s1, %s1801_s1 }
  0x1e   :  { %p1808_p0 = por %p1807_p13, %p1806_p12 }
  0x20   :  { %p1809_p1 = pnand %p1808_p0, %p1802_p11 }
  0x22   :  { %1812 = shalt.err (!%p1809_p1)
}
  0x23   :  { %24 = dma.hbm_to_vmem [thread:$0]  %s2000_s0, 128, %s22_s16, [#allocation3]  }
  0x24   :  { %s1813_s30 = scalar_lea.hbm %s2003_s3, 12288 }
  0x25   :  { %p1814_p2 = scmp.ne.s32.totalorder %s2003_s3, %s1813_s30  ;;  %p1817_p3 = scmp.lt.u32.totalorder %s1813_s30, %s2003_s3 }
  0x27   :  { %p1819_p4 = pnand %p1817_p3, %p1814_p2 }
  0x29   :  { %1822 = shalt.err (!%p1819_p4)
}
  0x2a   :  { %s1823_s12 = scalar_lea.vmem %s45_s18, 12288  ;;  %p1828_p6 = scmp.lt.s32.totalorder %s45_s18, %s45_s18 }
  0x2b   :  { %p1824_p5 = scmp.ne.s32.totalorder %s45_s18, %s1823_s12  ;;  %p1829_p7 = scmp.lt.s32.totalorder %s1823_s12, %s1823_s12 }
  0x2d   :  { %p1830_p8 = por %p1829_p7, %p1828_p6 }
  0x2f   :  { %p1831_p9 = pnand %p1830_p8, %p1824_p5 }
  0x31   :  { %1834 = shalt.err (!%p1831_p9)
}
  0x32   :  { %s1868_s0 = smov 192   ;;  %s1869_s13 = smov 12  }
  0x33   :  { %50 = dma.hbm_to_vmem [thread:$0]  %s2003_s3, 12288, %s45_s18, [#allocation5], %s1868_s0, %s1868_s0, %s1869_s13  }
  0x34   :  { %s1870_s16 = smov [#allocation7]   ;;  %s1835_s21 = scalar_lea.hbm %s2005_s5, 3072 }
  0x35   :  { %s58_s17 = sshll.u32 %s1870_s16, 4  ;;  %p1836_p10 = scmp.ne.s32.totalorder %s2005_s5, %s1835_s21  ;;  %s59_s17 = int_to_ptr.vmem [resolvable:$true] %s58_s17 }
  0x36   :  { %p1839_p11 = scmp.lt.u32.totalorder %s1835_s21, %s2005_s5 }
  0x38   :  { %p1841_p12 = pnand %p1839_p11, %p1836_p10 }
  0x3a   :  { %1844 = shalt.err (!%p1841_p12)
}
  0x3b   :  { %s1845_s1 = scalar_lea.vmem %s59_s17, 3072  ;;  %p1850_p0 = scmp.lt.s32.totalorder %s59_s17, %s59_s17 }
  0x3c   :  { %p1846_p13 = scmp.ne.s32.totalorder %s59_s17, %s1845_s1  ;;  %p1851_p1 = scmp.lt.s32.totalorder %s1845_s1, %s1845_s1 }
  0x3e   :  { %p1852_p2 = por %p1851_p1, %p1850_p0 }
  0x40   :  { %p1853_p3 = pnand %p1852_p2, %p1846_p13 }
  0x42   :  { %1856 = shalt.err (!%p1853_p3)
}
  0x43   :  { %s1871_s3 = smov 64   ;;  %s1872_s18 = smov 4  }
  0x44   :  { %64 = dma.hbm_to_vmem [thread:$0]  %s2005_s5, 3072, %s59_s17, [#allocation8], %s1871_s3, %s1871_s3, %s1872_s18  }
  0x45   :  { %1857 = dma.done.wait [#allocation3], 128  }
  0x46   :  { %1858 = vsyncadd [#allocation3], 4294967168 }
  0x47   :  { %1859 = dma.done.wait [#allocation5], 13312  }
  0x48   :  { %1860 = vsyncadd [#allocation5], 4294953984 }
  0x49   :  { %1861 = dma.done.wait [#allocation8], 3072  }
  0x4a   :  { %1862 = vsyncadd [#allocation8], 4294964224  ;;  %v1873_v0 = vmov 0   ;;  %v1605_v1 = vld [vmem:[#allocation4 + $0x4] ss:$16 sps:$4 sm:$0xff]   ;;  %v80_v5 = vld [vmem:[#allocation2] sm:$0xff]  ;;  %v92_v61 = vlaneseq }
  0x4b   :  { %188 = vmatprep.mubr.bf16.mxu0 %v1873_v0  ;;  %229 = vmatprep.mubr.bf16.mxu1 %v1873_v0  ;;  %v1607_v2 = vld [vmem:[#allocation4] ss:$16 sps:$4 sm:$0xff]   ;;  %v1608_v3 = vld [vmem:[#allocation4 + $0x24] ss:$16 sps:$4 sm:$0xff]   ;;  %v1611_v6 = vld [vmem:[#allocation4 + $0xc] ss:$16 sps:$4 sm:$0xff]   ;;  %v81_v9 = vpack.c.bf16 %v80_v5, %v80_v5 }
  0x4c   :  { %156 = vmatprep.subr.bf16.mxu0 %v1605_v1  ;;  %v1610_v4 = vld [vmem:[#allocation4 + $0x20] ss:$16 sps:$4 sm:$0xff]   ;;  %v1613_v7 = vld [vmem:[#allocation4 + $0x8] ss:$16 sps:$4 sm:$0xff]   ;;  %197 = vmatprep.subr.bf16.mxu1 %v1611_v6  ;;  %v1614_v8 = vld [vmem:[#allocation4 + $0x2c] ss:$16 sps:$4 sm:$0xff]  }
  0x4d   :  { %157 = vmatpush1.bf16.msra.mxu0 %v1607_v2  ;;  %198 = vmatpush1.bf16.msra.mxu1 %v1613_v7  ;;  %v1616_v10 = vld [vmem:[#allocation4 + $0x28] ss:$16 sps:$4 sm:$0xff]   ;;  %v1619_v11 = vld [vmem:[#allocation6 + $0x4] ss:$12 sps:$4 sm:$0xff]   ;;  %vm152_vm0 = vcmask 261120   ;;  %v1964_v62 = vshrl.u32 %v92_v61, 7 }
  0x4e   :  { %158 = vmatprep.subr.bf16.mxu0 %v1608_v3  ;;  %199 = vmatprep.subr.bf16.mxu1 %v1614_v8  ;;  %v1617_v12 = vld [vmem:[#allocation6] ss:$12 sps:$4 sm:$0xff]   ;;  %v1622_v13 = vld [vmem:[#allocation6 + $0x1c] ss:$12 sps:$4 sm:$0xff]   ;;  %v1620_v14 = vld [vmem:[#allocation6 + $0x18] ss:$12 sps:$4 sm:$0xff]  }
  0x4f   :  { %v1625_v15 = vld [vmem:[#allocation6 + $0x34] ss:$12 sps:$4 sm:$0xff]   ;;  %v1623_v16 = vld [vmem:[#allocation6 + $0x30] ss:$12 sps:$4 sm:$0xff]   ;;  %v1628_v17 = vld [vmem:[#allocation6 + $0x4c] ss:$12 sps:$4 sm:$0xff]  }
  0x50   :  { %v1626_v18 = vld [vmem:[#allocation6 + $0x48] ss:$12 sps:$4 sm:$0xff]   ;;  %v1631_v21 = vld [vmem:[#allocation6 + $0x64] ss:$12 sps:$4 sm:$0xff]   ;;  %v1649_v22 = vld [vmem:[#allocation6 + $0xe0] ss:$12 sps:$4 sm:$0xff]  }
  0x51   :  { %159 = vmatpush1.bf16.msra.mxu0 %v1610_v4  ;;  %200 = vmatpush1.bf16.msra.mxu1 %v1616_v10  ;;  %v1644_v19 = vld [vmem:[#allocation6 + $0xc8] ss:$12 sps:$4 sm:$0xff]   ;;  %v1650_v23 = vld [vmem:[#allocation6 + $0x20] ss:$12 sps:$4 sm:$0xff]   ;;  %v1654_v26 = vld [vmem:[#allocation6 + $0xf8] ss:$12 sps:$4 sm:$0xff]  }
  0x52   :  { %903 = vmatprep.subr.bf16.mxu0 %v1619_v11  ;;  %v1645_v20 = vld [vmem:[#allocation6 + $0x8] ss:$12 sps:$4 sm:$0xff]   ;;  %1491 = vmatprep.subr.bf16.mxu1 %v1644_v19  ;;  %v1629_v24 = vld [vmem:[#allocation6 + $0x60] ss:$12 sps:$4 sm:$0xff]   ;;  %v1655_v27 = vld [vmem:[#allocation6 + $0x38] ss:$12 sps:$4 sm:$0xff]  }
  0x53   :  { %v1634_v25 = vld [vmem:[#allocation6 + $0x7c] ss:$12 sps:$4 sm:$0xff]   ;;  %v1632_v28 = vld [vmem:[#allocation6 + $0x78] ss:$12 sps:$4 sm:$0xff]   ;;  %v1637_v29 = vld [vmem:[#allocation6 + $0x94] ss:$12 sps:$4 sm:$0xff]  }
  0x54   :  { %1368 = vmatmul.mubr.msk.bf16.vlgmr.msra.gmra.mrb[0].mxu0 %vm152_vm0, %v81_v9  ;;  %1369 = vmatmul.mubr.msk.bf16.vlgmr.msra.gmra.mrb[0].mxu1 %vm152_vm0, %v81_v9  ;;  %v1659_v30 = vld [vmem:[#allocation6 + $0x110] ss:$12 sps:$4 sm:$0xff]   ;;  %v1664_v33 = vld [vmem:[#allocation6 + $0x128] ss:$12 sps:$4 sm:$0xff]   ;;  %v1640_v34 = vld [vmem:[#allocation6 + $0xac] ss:$12 sps:$4 sm:$0xff]  }
  0x55   :  { %904 = vmatpush1.bf16.msra.mxu0 %v1617_v12  ;;  %1492 = vmatpush3.bf16.msra.mxu1 %v1645_v20  ;;  %v1660_v31 = vld [vmem:[#allocation6 + $0x50] ss:$12 sps:$4 sm:$0xff]   ;;  %v1665_v35 = vld [vmem:[#allocation6 + $0x68] ss:$12 sps:$4 sm:$0xff]   ;;  %v1669_v37 = vld [vmem:[#allocation6 + $0x140] ss:$12 sps:$4 sm:$0xff]  }
  0x56   :  { %905 = vmatprep.subr.bf16.mxu0 %v1622_v13  ;;  %1493 = vmatprep.subr.bf16.mxu1 %v1649_v22  ;;  %v1635_v32 = vld [vmem:[#allocation6 + $0x90] ss:$12 sps:$4 sm:$0xff]   ;;  %v1638_v36 = vld [vmem:[#allocation6 + $0xa8] ss:$12 sps:$4 sm:$0xff]   ;;  %v1670_v39 = vld [vmem:[#allocation6 + $0x80] ss:$12 sps:$4 sm:$0xff]  }
  0x57   :  { %v1643_v38 = vld [vmem:[#allocation6 + $0xc4] ss:$12 sps:$4 sm:$0xff]   ;;  %v1641_v40 = vld [vmem:[#allocation6 + $0xc0] ss:$12 sps:$4 sm:$0xff]   ;;  %v1648_v41 = vld [vmem:[#allocation6 + $0xdc] ss:$12 sps:$4 sm:$0xff]  }
  0x58   :  { %v1646_v42 = vld [vmem:[#allocation6 + $0xd8] ss:$12 sps:$4 sm:$0xff]   ;;  %v1653_v43 = vld [vmem:[#allocation6 + $0xf4] ss:$12 sps:$4 sm:$0xff]   ;;  %v1651_v44 = vld [vmem:[#allocation6 + $0xf0] ss:$12 sps:$4 sm:$0xff]  }
  0x59   :  { %906 = vmatpush1.bf16.msra.mxu0 %v1620_v14  ;;  %1494 = vmatpush3.bf16.msra.mxu1 %v1650_v23  ;;  %v1658_v45 = vld [vmem:[#allocation6 + $0x10c] ss:$12 sps:$4 sm:$0xff]   ;;  %v1656_v46 = vld [vmem:[#allocation6 + $0x108] ss:$12 sps:$4 sm:$0xff]   ;;  %v1663_v47 = vld [vmem:[#allocation6 + $0x124] ss:$12 sps:$4 sm:$0xff]  }
  0x5a   :  { %907 = vmatprep.subr.bf16.mxu0 %v1625_v15  ;;  %1495 = vmatprep.subr.bf16.mxu1 %v1654_v26  ;;  %v1661_v48 = vld [vmem:[#allocation6 + $0x120] ss:$12 sps:$4 sm:$0xff]   ;;  %v1668_v49 = vld [vmem:[#allocation6 + $0x13c] ss:$12 sps:$4 sm:$0xff]   ;;  %v1666_v50 = vld [vmem:[#allocation6 + $0x138] ss:$12 sps:$4 sm:$0xff]  }
  0x5b   :  { %v1673_v51 = vld [vmem:[#allocation6 + $0x154] ss:$12 sps:$4 sm:$0xff]   ;;  %v1674_v52 = vld [vmem:[#allocation6 + $0x158] ss:$12 sps:$4 sm:$0xff]   ;;  %v1671_v53 = vld [vmem:[#allocation6 + $0x150] ss:$12 sps:$4 sm:$0xff]  }
  0x5c   :  { %v1675_v54 = vld [vmem:[#allocation6 + $0x98] ss:$12 sps:$4 sm:$0xff]   ;;  %v1679_v56 = vld [vmem:[#allocation6 + $0x170] ss:$12 sps:$4 sm:$0xff]   ;;  %v1676_v57 = vld [vmem:[#allocation6 + $0x168] ss:$12 sps:$4 sm:$0xff]  }
  0x5d   :  { %908 = vmatpush1.bf16.msra.mxu0 %v1623_v16  ;;  %1496 = vmatpush3.bf16.msra.mxu1 %v1655_v27  ;;  %v1678_v55 = vld [vmem:[#allocation6 + $0x16c] ss:$12 sps:$4 sm:$0xff]   ;;  %v1680_v58 = vld [vmem:[#allocation6 + $0xb0] ss:$12 sps:$4 sm:$0xff]   ;;  %v1684_v60 = vld [vmem:[#allocation6 + $0x248] ss:$12 sps:$4 sm:$0xff]  }
  0x5e   :  { %909 = vmatprep.subr.bf16.mxu0 %v1628_v17  ;;  %1497 = vmatprep.subr.bf16.mxu1 %v1659_v30  ;;  %v1683_v59 = vld [vmem:[#allocation6 + $0x184] ss:$12 sps:$4 sm:$0xff]   ;;  %v94_v63 = vsub.s32 0, %v1964_v62  ;;  %v1970_v0 = vld [vmem:[%s2002_s2] sm:$0xf]  ;;  %v98_v1 = vsub.s32 1, %v1964_v62 }
  0x5f   :  { %v106_v3 = vsub.s32 3, %v1964_v62  ;;  %v1681_v19 = vld [vmem:[#allocation6 + $0x180] ss:$12 sps:$4 sm:$0xff]   ;;  %v1685_v20 = vld [vmem:[#allocation6 + $0x188] ss:$12 sps:$4 sm:$0xff]   ;;  %vm1875_vm1 = vmmov 0  }
  0x60   :  { %v95_v2 = vrot.slane %v1970_v0, %v94_v63  ;;  %v99_v4 = vrot.slane %v1970_v0, %v98_v1  ;;  %v1688_v23 = vld [vmem:[#allocation6 + $0x19c] ss:$12 sps:$4 sm:$0xff]   ;;  %v1686_v27 = vld [vmem:[#allocation6 + $0x198] ss:$12 sps:$4 sm:$0xff]   ;;  %vm1351_vm2 = vcmask 15360  }
  0x61   :  { %910 = vmatpush1.bf16.msra.mxu0 %v1626_v18  ;;  %1498 = vmatpush3.bf16.msra.mxu1 %v1660_v31  ;;  %v107_v8 = vrot.slane %v1970_v0, %v106_v3  ;;  %v1694_v30 = vld [vmem:[#allocation6 + $0x278] ss:$12 sps:$4 sm:$0xff]   ;;  %v1691_v31 = vld [vmem:[#allocation6 + $0x1b0] ss:$12 sps:$4 sm:$0xff]  }
  0x62   :  { %911 = vmatprep.subr.bf16.mxu0 %v1631_v21  ;;  %1499 = vmatprep.subr.bf16.mxu1 %v1664_v33  ;;  %v1698_v33 = vld [vmem:[#allocation6 + $0x1cc] ss:$12 sps:$4 sm:$0xff]  }
  0x63   :  { %v1724_v61 = vld [vmem:[#allocation6 + $0x258] ss:$12 sps:$4 sm:$0xff]  }
  0x64   :  { %v1732_v3 = vld [vmem:[#allocation6 + $0x28c] ss:$12 sps:$4 sm:$0xff]  }
  0x65   :  { %912 = vmatpush1.bf16.msra.mxu0 %v1629_v24  ;;  %1500 = vmatpush3.bf16.msra.mxu1 %v1665_v35  ;;  %v1689_v24 = vld [vmem:[#allocation6 + $0x260] ss:$12 sps:$4 sm:$0xff]   ;;  %v1696_v35 = vld [vmem:[#allocation6 + $0x1c8] ss:$12 sps:$4 sm:$0xff]  }
  0x66   :  { %913 = vmatprep.subr.bf16.mxu0 %v1634_v25  ;;  %1501 = vmatprep.subr.bf16.mxu1 %v1669_v37  ;;  %v1703_v37 = vld [vmem:[#allocation6 + $0x1e4] ss:$12 sps:$4 sm:$0xff]  }
  0x69   :  { %914 = vmatpush1.bf16.msra.mxu0 %v1632_v28  ;;  %1502 = vmatpush3.bf16.msra.mxu1 %v1670_v39  ;;  %v1690_v28 = vld [vmem:[#allocation6 + $0x1a0] ss:$12 sps:$4 sm:$0xff]   ;;  %v102_v39 = vsub.s32 2, %v1964_v62  ;;  %v1763_v62 = vld [vmem:[#allocation7 + $0x90] sm:$0xff]  }
  0x6a   :  { %915 = vmatprep.subr.bf16.mxu0 %v1637_v29  ;;  %1503 = vmatprep.subr.bf16.mxu1 %v1674_v52  ;;  %v1693_v29 = vld [vmem:[#allocation6 + $0x1b4] ss:$12 sps:$4 sm:$0xff]   ;;  %v1718_v52 = vld [vmem:[#allocation6 + $0x22c] ss:$12 sps:$4 sm:$0xff]  }
  0x6d   :  { %916 = vmatpush1.bf16.msra.mxu0 %v1635_v32  ;;  %1504 = vmatpush3.bf16.msra.mxu1 %v1675_v54  ;;  %v1695_v32 = vld [vmem:[#allocation6 + $0x1b8] ss:$12 sps:$4 sm:$0xff]  }
  0x6e   :  { %917 = vmatprep.subr.bf16.mxu0 %v1640_v34  ;;  %1505 = vmatprep.subr.bf16.mxu1 %v1679_v56  ;;  %v1699_v34 = vld [vmem:[#allocation6 + $0x290] ss:$12 sps:$4 sm:$0xff]  }
  0x6f   :  { %v1720_v56 = vld [vmem:[#allocation6 + $0x230] ss:$12 sps:$4 sm:$0xff]  }
  0x71   :  { %918 = vmatpush1.bf16.msra.mxu0 %v1638_v36  ;;  %1506 = vmatpush3.bf16.msra.mxu1 %v1680_v58  ;;  %v1700_v36 = vld [vmem:[#allocation6 + $0x1d0] ss:$12 sps:$4 sm:$0xff]  }
  0x72   :  { %919 = vmatprep.subr.bf16.mxu0 %v1643_v38  ;;  %1513 = vmatprep.subr.bf16.mxu1 %v1684_v60  ;;  %v1704_v38 = vld [vmem:[#allocation6 + $0x2a8] ss:$12 sps:$4 sm:$0xff]  }
  0x73   :  { %v1726_v60 = vld [vmem:[#allocation6 + $0x25c] ss:$12 sps:$4 sm:$0xff]  }
  0x75   :  { %920 = vmatpush1.bf16.msra.mxu0 %v1641_v40  ;;  %v1701_v40 = vld [vmem:[#allocation6 + $0x1e0] ss:$12 sps:$4 sm:$0xff]  }
  0x76   :  { %921 = vmatprep.subr.bf16.mxu0 %v1648_v41  ;;  %v1705_v41 = vld [vmem:[#allocation6 + $0x1e8] ss:$12 sps:$4 sm:$0xff]  }
  0x79   :  { %922 = vmatpush1.bf16.msra.mxu0 %v1646_v42  ;;  %v1708_v42 = vld [vmem:[#allocation6 + $0x1fc] ss:$12 sps:$4 sm:$0xff]  }
  0x7a   :  { %923 = vmatprep.subr.bf16.mxu0 %v1653_v43  ;;  %v1709_v43 = vld [vmem:[#allocation6 + $0x2c0] ss:$12 sps:$4 sm:$0xff]  }
  0x7d   :  { %924 = vmatpush1.bf16.msra.mxu0 %v1651_v44  ;;  %v103_v44 = vrot.slane %v1970_v0, %v102_v39  ;;  %v1729_v0 = vld [vmem:[#allocation6 + $0x274] ss:$12 sps:$4 sm:$0xff]  }
  0x7e   :  { %925 = vmatprep.subr.bf16.mxu0 %v1658_v45  ;;  %v1706_v45 = vld [vmem:[#allocation6 + $0x1f8] ss:$12 sps:$4 sm:$0xff]  }
  0x81   :  { %926 = vmatpush1.bf16.msra.mxu0 %v1656_v46  ;;  %v1710_v46 = vld [vmem:[#allocation6 + $0x200] ss:$12 sps:$4 sm:$0xff]  }
  0x82   :  { %927 = vmatprep.subr.bf16.mxu0 %v1663_v47  ;;  %v1713_v47 = vld [vmem:[#allocation6 + $0x214] ss:$12 sps:$4 sm:$0xff]  }
  0x85   :  { %928 = vmatpush1.bf16.msra.mxu0 %v1661_v48  ;;  %v1714_v48 = vld [vmem:[#allocation6 + $0x2d8] ss:$12 sps:$4 sm:$0xff]  }
  0x86   :  { %929 = vmatprep.subr.bf16.mxu0 %v1668_v49 }
  0x89   :  { %930 = vmatpush1.bf16.msra.mxu0 %v1666_v50  ;;  %v1711_v50 = vld [vmem:[#allocation6 + $0x210] ss:$12 sps:$4 sm:$0xff]  }
  0x8a   :  { %931 = vmatprep.subr.bf16.mxu0 %v1673_v51  ;;  %v1715_v51 = vld [vmem:[#allocation6 + $0x218] ss:$12 sps:$4 sm:$0xff]  }
  0x8d   :  { %932 = vmatpush1.bf16.msra.mxu0 %v1671_v53  ;;  %v1719_v53 = vld [vmem:[#allocation6 + $0x2f0] ss:$12 sps:$4 sm:$0xff]  }
  0x8e   :  { %933 = vmatprep.subr.bf16.mxu0 %v1678_v55  ;;  %v1716_v55 = vld [vmem:[#allocation6 + $0x228] ss:$12 sps:$4 sm:$0xff]  }
  0x91   :  { %934 = vmatpush1.bf16.msra.mxu0 %v1676_v57  ;;  %v1723_v57 = vld [vmem:[#allocation6 + $0x244] ss:$12 sps:$4 sm:$0xff]  }
  0x92   :  { %944 = vmatprep.subr.bf16.mxu0 %v1683_v59  ;;  %v1721_v59 = vld [vmem:[#allocation6 + $0x240] ss:$12 sps:$4 sm:$0xff]  }
 0x127   :  { %v190_v5 = vpop.f32.mrb[0].mxu0  ;;  %v231_v13 = vpop.f32.mrb[0].mxu1 }
 0x128   :  { %v191_v6 = vadd.f32 %v190_v5, %v95_v2  ;;  %v192_v7 = vpop.f32.mrb[1].mxu0  ;;  %v233_v15 = vpop.f32.mrb[1].mxu1  ;;  %v232_v49 = vadd.f32 %v231_v13, %v103_v44  ;;  %v1727_v2 = vld [vmem:[#allocation6 + $0x270] ss:$12 sps:$4 sm:$0xff]   ;;  %v1745_v13 = vld [vmem:[#allocation7 + $0x40] sm:$0xff]  }
 0x129   :  { %v193_v9 = vadd.f32 %v192_v7, %v99_v4  ;;  %v194_v10 = vpop.f32.mrb[2].mxu0  ;;  %v234_v16 = vadd.f32 %v233_v15, %v107_v8  ;;  %v235_v17 = vpop.f32.mrb[2].mxu1  ;;  %v1730_v4 = vld [vmem:[#allocation6 + $0x288] ss:$12 sps:$4 sm:$0xff]   ;;  %v1735_v5 = vld [vmem:[#allocation6 + $0x2a4] ss:$12 sps:$4 sm:$0xff]  }
 0x12a   :  { %v238_v11 = vmax.f32 %v191_v6, 0.0  ;;  %v195_v12 = vpop.f32.mrb[3].mxu0  ;;  %v236_v21 = vpop.f32.mrb[3].mxu1  ;;  %v240_v54 = vmax.f32 %v232_v49, 0.0  ;;  %v1733_v6 = vld [vmem:[#allocation6 + $0x2a0] ss:$12 sps:$4 sm:$0xff]  }
 0x12b   :  { %v239_v14 = vmax.f32 %v193_v9, 0.0  ;;  %v241_v25 = vmax.f32 %v234_v16, 0.0  ;;  %v1738_v7 = vld [vmem:[#allocation6 + $0x2bc] ss:$12 sps:$4 sm:$0xff]   ;;  %v1736_v8 = vld [vmem:[#allocation6 + $0x2b8] ss:$12 sps:$4 sm:$0xff]  }
 0x12c   :  { %v242_v22 = vpack.c.bf16 %v238_v11, %v238_v11  ;;  %v244_v58 = vpack.c.bf16 %v240_v54, %v240_v54  ;;  %v1741_v9 = vld [vmem:[#allocation6 + $0x2d4] ss:$12 sps:$4 sm:$0xff]   ;;  %v1739_v10 = vld [vmem:[#allocation6 + $0x2d0] ss:$12 sps:$4 sm:$0xff]   ;;  %v1744_v11 = vld [vmem:[#allocation6 + $0x2ec] ss:$12 sps:$4 sm:$0xff]  }
 0x12d   :  { %v243_v18 = vpack.c.bf16 %v239_v14, %v239_v14  ;;  %v245_v26 = vpack.c.bf16 %v241_v25, %v241_v25  ;;  %v1742_v12 = vld [vmem:[#allocation6 + $0x2e8] ss:$12 sps:$4 sm:$0xff]   ;;  %v1746_v14 = vld [vmem:[#allocation7] sm:$0xff]  }
 0x12e   :  { %v1747_v15 = vld [vmem:[#allocation7 + $0x48] sm:$0xff]   ;;  %v1749_v17 = vld [vmem:[#allocation7 + $0x50] sm:$0xff]   ;;  %v1753_v21 = vld [vmem:[#allocation7 + $0x60] sm:$0xff]  }
 0x12f   :  { %935 = vmatprep.mubr.bf16.mxu0 %v243_v18  ;;  %1017 = vmatprep.mubr.bf16.mxu1 %v243_v18  ;;  %v1748_v16 = vld [vmem:[#allocation7 + $0x8] sm:$0xff]   ;;  %v1750_v18 = vld [vmem:[#allocation7 + $0x10] sm:$0xff]  }
 0x130   :  { %936 = vmatmul.mubr.bf16.vlgmr.msra.gmra.mrb[4].mxu0 %v242_v22  ;;  %1018 = vmatmul.mubr.bf16.vlgmr.msra.gmra.mrb[4].mxu1 %v242_v22  ;;  %v1754_v22 = vld [vmem:[#allocation7 + $0x20] sm:$0xff]   ;;  %v1757_v25 = vld [vmem:[#allocation7 + $0x70] sm:$0xff]  }
 0x131   :  { %945 = vmatpush1.bf16.msra.mxu0 %v1681_v19  ;;  %1514 = vmatpush3.bf16.msra.mxu1 %v1685_v20  ;;  %v1751_v19 = vld [vmem:[#allocation7 + $0x58] sm:$0xff]  }
 0x132   :  { %946 = vmatprep.subr.bf16.mxu0 %v1688_v23  ;;  %1515 = vmatprep.subr.bf16.mxu1 %v1689_v24  ;;  %v1752_v20 = vld [vmem:[#allocation7 + $0x18] sm:$0xff]   ;;  %v1755_v23 = vld [vmem:[#allocation7 + $0x68] sm:$0xff]  }
 0x133   :  { %1057 = vmatprep.mubr.bf16.mxu1 %v245_v26  ;;  %976 = vmatprep.mubr.bf16.mxu0 %v245_v26  ;;  %v1756_v24 = vld [vmem:[#allocation7 + $0x28] sm:$0xff]   ;;  %v1758_v26 = vld [vmem:[#allocation7 + $0x30] sm:$0xff]  }
 0x135   :  { %947 = vmatpush1.bf16.msra.mxu0 %v1686_v27  ;;  %1516 = vmatpush3.bf16.msra.mxu1 %v1690_v28  ;;  %v1759_v27 = vld [vmem:[#allocation7 + $0x78] sm:$0xff]  }
 0x136   :  { %948 = vmatprep.subr.bf16.mxu0 %v1693_v29  ;;  %1517 = vmatprep.subr.bf16.mxu1 %v1694_v30  ;;  %v1760_v28 = vld [vmem:[#allocation7 + $0x38] sm:$0xff]   ;;  %v1874_v29 = vmov 0.0  }
 0x139   :  { %949 = vmatpush1.bf16.msra.mxu0 %v1691_v31  ;;  %1518 = vmatpush3.bf16.msra.mxu1 %v1695_v32 }
 0x13a   :  { %950 = vmatprep.subr.bf16.mxu0 %v1698_v33  ;;  %1519 = vmatprep.subr.bf16.mxu1 %v1699_v34 }
 0x13d   :  { %951 = vmatpush1.bf16.msra.mxu0 %v1696_v35  ;;  %1520 = vmatpush3.bf16.msra.mxu1 %v1700_v36  ;;  %v374_v35 = vld [vmem:[%s2004_s4] sm:$0x7] }
 0x13e   :  { %952 = vmatprep.subr.bf16.mxu0 %v1703_v37  ;;  %1521 = vmatprep.subr.bf16.mxu1 %v1704_v38  ;;  %v387_v36 = vrot.slane %v374_v35, %v102_v39 }
 0x141   :  { %953 = vmatpush1.bf16.msra.mxu0 %v1701_v40  ;;  %1522 = vmatpush3.bf16.msra.mxu1 %v1705_v41 }
 0x142   :  { %954 = vmatprep.subr.bf16.mxu0 %v1708_v42  ;;  %1523 = vmatprep.subr.bf16.mxu1 %v1709_v43 }
 0x145   :  { %955 = vmatpush1.bf16.msra.mxu0 %v1706_v45  ;;  %1524 = vmatpush3.bf16.msra.mxu1 %v1710_v46  ;;  %v379_v45 = vrot.slane %v374_v35, %v94_v63  ;;  %v383_v46 = vrot.slane %v374_v35, %v98_v1  ;;  %v1764_v63 = vld [vmem:[#allocation7 + $0x98] sm:$0xff]   ;;  %v1765_v1 = vld [vmem:[#allocation7 + $0xa0] sm:$0xff]  }
 0x146   :  { %956 = vmatprep.subr.bf16.mxu0 %v1713_v47  ;;  %1525 = vmatprep.subr.bf16.mxu1 %v1714_v48 }
 0x149   :  { %957 = vmatpush1.bf16.msra.mxu0 %v1711_v50  ;;  %1526 = vmatpush3.bf16.msra.mxu1 %v1715_v51 }
 0x14a   :  { %958 = vmatprep.subr.bf16.mxu0 %v1718_v52  ;;  %1527 = vmatprep.subr.bf16.mxu1 %v1719_v53 }
 0x14d   :  { %959 = vmatpush1.bf16.msra.mxu0 %v1716_v55  ;;  %1528 = vmatpush3.bf16.msra.mxu1 %v1720_v56  ;;  %v1761_v55 = vld [vmem:[#allocation7 + $0x80] sm:$0xff]  }
 0x14e   :  { %960 = vmatprep.subr.bf16.mxu0 %v1723_v57  ;;  %1535 = vmatprep.subr.bf16.mxu1 %v1745_v13  ;;  %v1762_v57 = vld [vmem:[#allocation7 + $0x88] sm:$0xff]  }
 0x150   :  { %1058 = vmatmul.mubr.bf16.vlgmr.msra.gmra.mrb[8].mxu1 %v244_v58 }
 0x151   :  { %961 = vmatpush1.bf16.msra.mxu0 %v1721_v59  ;;  %1536 = vmatpush3.bf16.msra.mxu1 %v1746_v14  ;;  %v1767_v59 = vld [vmem:[#allocation7 + $0xb0] sm:$0xff]  }
 0x152   :  { %962 = vmatprep.subr.bf16.mxu0 %v1726_v60  ;;  %1537 = vmatprep.subr.bf16.mxu1 %v1747_v15  ;;  %v1768_v60 = vld [vmem:[#allocation7 + $0xb8] sm:$0xff]  }
 0x155   :  { %963 = vmatpush1.bf16.msra.mxu0 %v1724_v61  ;;  %1538 = vmatpush3.bf16.msra.mxu1 %v1748_v16 }
 0x156   :  { %964 = vmatprep.subr.bf16.mxu0 %v1729_v0  ;;  %1539 = vmatprep.subr.bf16.mxu1 %v1749_v17 }
 0x159   :  { %965 = vmatpush1.bf16.msra.mxu0 %v1727_v2  ;;  %1540 = vmatpush3.bf16.msra.mxu1 %v1750_v18 }
 0x15a   :  { %966 = vmatprep.subr.bf16.mxu0 %v1732_v3  ;;  %1541 = vmatprep.subr.bf16.mxu1 %v1751_v19 }
 0x15d   :  { %967 = vmatpush1.bf16.msra.mxu0 %v1730_v4  ;;  %1542 = vmatpush3.bf16.msra.mxu1 %v1752_v20 }
 0x15e   :  { %968 = vmatprep.subr.bf16.mxu0 %v1735_v5  ;;  %1543 = vmatprep.subr.bf16.mxu1 %v1753_v21 }
 0x161   :  { %969 = vmatpush1.bf16.msra.mxu0 %v1733_v6  ;;  %1544 = vmatpush3.bf16.msra.mxu1 %v1754_v22 }
 0x162   :  { %970 = vmatprep.subr.bf16.mxu0 %v1738_v7  ;;  %1545 = vmatprep.subr.bf16.mxu1 %v1755_v23 }
 0x165   :  { %971 = vmatpush1.bf16.msra.mxu0 %v1736_v8  ;;  %1546 = vmatpush3.bf16.msra.mxu1 %v1756_v24  ;;  %v1490_v8 = vld [vmem:[%s2006_s6] ss:$0 sm:$0xff] }
 0x166   :  { %972 = vmatprep.subr.bf16.mxu0 %v1741_v9  ;;  %1547 = vmatprep.subr.bf16.mxu1 %v1757_v25 }
 0x169   :  { %973 = vmatpush1.bf16.msra.mxu0 %v1739_v10  ;;  %1548 = vmatpush3.bf16.msra.mxu1 %v1758_v26 }
 0x16a   :  { %974 = vmatprep.subr.bf16.mxu0 %v1744_v11  ;;  %1549 = vmatprep.subr.bf16.mxu1 %v1759_v27 }
 0x16d   :  { %975 = vmatpush1.bf16.msra.mxu0 %v1742_v12  ;;  %1550 = vmatpush3.bf16.msra.mxu1 %v1760_v28 }
 0x16e   :  { %1566 = vmatprep.subr.bf16.mxu1 %v1874_v29 }
 0x170   :  { %977 = vmatmul.mubr.bf16.vlgmr.msra.gmra.mrb[4].mxu0 %v244_v58  ;;  %v1766_v58 = vld [vmem:[#allocation7 + $0xa8] sm:$0xff]  }
 0x203   :  { %v1507_v30 = vpop.f32.mrb[4].mxu1 }
 0x204   :  { %v1508_v31 = vpop.f32.mrb[5].mxu1 }
 0x205   :  { %v1509_v32 = vadd.f32 %v1508_v31, %v1507_v30  ;;  %v1510_v33 = vpop.f32.mrb[6].mxu1 }
 0x206   :  { %v1511_v34 = vpop.f32.mrb[7].mxu1 }
 0x207   :  { %v1020_v40 = vadd.f32 %v1509_v32, %v387_v36 }
 0x223   :  { %v1529_v37 = vpop.f32.mrb[8].mxu1 }
 0x224   :  { %v1530_v38 = vpop.f32.mrb[9].mxu1 }
 0x225   :  { %v1531_v41 = vadd.f32 %v1530_v38, %v1529_v37  ;;  %v1532_v42 = vpop.f32.mrb[10].mxu1 }
 0x226   :  { %v1533_v43 = vpop.f32.mrb[11].mxu1 }
 0x227   :  { %v1060_v44 = vadd.f32 %v1531_v41, %v1020_v40 }
 0x229   :  { %v1067_v61 = vmax.f32 %v1060_v44, 0.0 }
 0x22b   :  { %v1070_v0 = vpack.c.bf16 %v1067_v61, %v1067_v61 }
 0x243   :  { %v978_v47 = vpop.f32.mrb[4].mxu0 }
 0x244   :  { %v1586_v48 = vadd.f32 %v978_v47, %v379_v45  ;;  %v980_v49 = vpop.f32.mrb[5].mxu0 }
 0x245   :  { %v1587_v50 = vadd.f32 %v980_v49, %v383_v46  ;;  %v982_v51 = vpop.f32.mrb[6].mxu0 }
 0x246   :  { %v1065_v52 = vmax.f32 %v1586_v48, 0.0  ;;  %v983_v39 = vpop.f32.mrb[7].mxu0 }
 0x247   :  { %v1066_v53 = vmax.f32 %v1587_v50, 0.0 }
 0x248   :  { %v1068_v56 = vpack.c.bf16 %v1065_v52, %v1065_v52 }
 0x249   :  { %v1069_v54 = vpack.c.bf16 %v1066_v53, %v1066_v53 }
 0x24b   :  { %1295 = vmatprep.mubr.bf16.mxu1 %v1069_v54 }
 0x24c   :  { %1296 = vmatmul.mubr.bf16.vlgmr.msra.gmra.mrb[12].mxu1 %v1068_v56 }
 0x24d   :  { %1567 = vmatpush3.bf16.msra.mxu1 %v1761_v55  ;;  %1582 = vmatprep.mubr.msk.bf16.mxu1 %vm1875_vm1, %v1874_v29 }
 0x24e   :  { %1568 = vmatprep.subr.bf16.mxu1 %v1874_v29 }
 0x251   :  { %1569 = vmatpush3.bf16.msra.mxu1 %v1762_v57 }
 0x252   :  { %1570 = vmatprep.subr.bf16.mxu1 %v1874_v29 }
 0x255   :  { %1571 = vmatpush3.bf16.msra.mxu1 %v1763_v62 }
 0x256   :  { %1572 = vmatprep.subr.bf16.mxu1 %v1874_v29 }
 0x259   :  { %1573 = vmatpush3.bf16.msra.mxu1 %v1764_v63 }
 0x25a   :  { %1574 = vmatprep.subr.bf16.mxu1 %v1874_v29 }
 0x25d   :  { %1575 = vmatpush3.bf16.msra.mxu1 %v1765_v1 }
 0x25e   :  { %1576 = vmatprep.subr.bf16.mxu1 %v1874_v29 }
 0x261   :  { %1577 = vmatpush3.bf16.msra.mxu1 %v1766_v58 }
 0x262   :  { %1578 = vmatprep.subr.bf16.mxu1 %v1874_v29 }
 0x265   :  { %1579 = vmatpush3.bf16.msra.mxu1 %v1767_v59 }
 0x266   :  { %1580 = vmatprep.subr.bf16.mxu1 %v1874_v29 }
 0x269   :  { %1581 = vmatpush3.bf16.msra.mxu1 %v1768_v60 }
 0x26c   :  { %1583 = vmatmul.mubr.bf16.vlgmr.msra.gmra.mrb[16].mxu1 %v1070_v0 }
 0x31f   :  { %v1551_v2 = vpop.f32.mrb[12].mxu1 }
 0x320   :  { %v1552_v3 = vpop.f32.mrb[13].mxu1 }
 0x321   :  { %v1553_v4 = vadd.f32 %v1552_v3, %v1551_v2  ;;  %v1554_v5 = vpop.f32.mrb[14].mxu1 }
 0x322   :  { %v1555_v6 = vpop.f32.mrb[15].mxu1 }
 0x33f   :  { %v1337_v7 = vpop.f32.mrb[16].mxu1 }
 0x340   :  { %v1338_v9 = vadd.f32 %v1553_v4, %v1337_v7  ;;  %v1584_v10 = vpop.f32.mrb[17].mxu1 }
 0x341   :  { %v1340_v11 = vpop.f32.mrb[18].mxu1 }
 0x342   :  { %v1350_v12 = vadd.f32 %v1490_v8, %v1338_v9  ;;  %v1585_v13 = vpop.f32.mrb[19].mxu1 }
 0x344   :  { %1352 = vst.msk [vmem:[%s2007_s7] sm:$0xff] %vm1351_vm2, %v1350_v12 }
 0x345   :  { %1357 = vsyncpa [#allocation3], 1 }
 0x346   :  { %1358 = vsyncpa [#allocation5], 1 }
 0x347   :  { %1359 = vsyncpa [#allocation8], 1 }

</bundles_post_ra>
